<compile_context>
chip_gen: v7x
topology: tpu7x:2x2x1
jax: 0.10.0
libtpu: 0.0.40
codegen_flags: <defaults>
</compile_context>

<pallas_src>
import jax
import jax.numpy as jnp
from jax.experimental import pallas as pl
from jax.experimental.pallas import tpu as pltpu

_LANE = 128
_MAX_COLS = 2048
_BLOCK_BUDGET_BYTES = 4 << 20     # ~4 MiB per block (fits all chips' scoped VMEM)
_VMEM_LIMIT_BYTES = 32 << 20      # explicit headroom; safe on v5e/v6e/v7x


def _copy_kernel(x_ref, o_ref):
    # ShapePrinter.forward hot path: return x unchanged.
    o_ref[...] = x_ref[...]


def _sublane_quantum(itemsize: int) -> int:
    """Native sublane rows per vreg tile: f32 -> 8, bf16 -> 16, int8/fp8 -> 32."""
    return max(8, 32 // max(1, itemsize))


def _lane_dense_view(padded_total: int, sub: int) -> tuple[int, int]:
    """(rows, cols) view with cols a multiple of 128 and rows a multiple of `sub`."""
    cols = _LANE
    rows = padded_total // _LANE
    # Widen cols (lane-dense, unmasked vst) while rows stays a multiple of `sub`.
    while cols < _MAX_COLS and rows % (2 * sub) == 0:
        rows //= 2
        cols *= 2
    return rows, cols


def _pick_block_rows(rows: int, cols: int, itemsize: int, sub: int) -> int:
    """Largest multiple-of-`sub` row count whose block fits the per-block budget."""
    if rows <= sub:
        return rows
    max_rows = max(sub, (_BLOCK_BUDGET_BYTES // (cols * itemsize)) // sub * sub)
    return min(rows, max_rows)


def _identity_copy_kernel(x):
    """Tiled, lane-dense Pallas identity copy of x (any shape / dtype)."""
    orig_shape = x.shape
    total = x.size
    if total == 0:
        return x

    itemsize = jnp.dtype(x.dtype).itemsize
    sub = _sublane_quantum(itemsize)
    quantum = sub * _LANE

    flat = x.reshape(-1)
    pad = (-total) % quantum
    if pad:
        # Pad to a lane/sublane-dense multiple so every block uses full-width stores.
        flat = jnp.pad(flat, (0, pad))
    padded_total = total + pad

    rows, cols = _lane_dense_view(padded_total, sub)
    block_rows = _pick_block_rows(rows, cols, itemsize, sub)
    grid_steps = pl.cdiv(rows, block_rows)   # ragged last block handled by Pallas

    out2 = pl.pallas_call(
        _copy_kernel,
        out_shape=jax.ShapeDtypeStruct((rows, cols), x.dtype),
        grid=(grid_steps,),
        in_specs=[pl.BlockSpec((block_rows, cols), lambda i: (i, 0))],
        out_specs=pl.BlockSpec((block_rows, cols), lambda i: (i, 0)),
        compiler_params=pltpu.CompilerParams(
            # Only meaningful (v7x two-TC sharding) when there are >= 2 grid steps.
            dimension_semantics=("parallel",) if grid_steps >= 2 else ("arbitrary",),
            vmem_limit_bytes=_VMEM_LIMIT_BYTES,
        ),
    )(flat.reshape(rows, cols))

    out_flat = out2.reshape(-1)
    if pad:
        out_flat = out_flat[:total]
    return out_flat.reshape(orig_shape)


def shape_printer_forward(x, verbose: bool = False, force_kernel: bool = False):
    """Pallas implementation of ShapePrinter.forward: identity on x.

    Default path is a true no-op (return x) -- the optimal implementation of an
    identity module.  Set force_kernel=True to route through the Pallas copy
    kernel (demo / contractual path).
    """
    if verbose:
        # Shape is static at trace time; jax.debug.print fires once per call even
        # under jit, matching the per-forward print of the PyTorch module.
        jax.debug.print(f"SHAPE: {tuple(x.shape)}")

    if not force_kernel:
        return x
    return _identity_copy_kernel(x)


if __name__ == "__main__":
    key = jax.random.PRNGKey(0)
    # Small NCHW input consistent with an autoencoder intermediate tensor.
    shape = (2, 4, 16, 16)
    x = jax.random.normal(key, shape, dtype=jnp.float32)

    # Default (optimal) path: pure identity, no kernel launched.
    y_fast = shape_printer_forward(x, verbose=False)
    assert y_fast is x

    # Kernel path: run the Pallas identity copy once and verify.
    y = shape_printer_forward(x, verbose=False, force_kernel=True)
    y = jax.block_until_ready(y)

    assert y.shape == shape and y.dtype == jnp.float32
    assert bool(jnp.array_equal(y, x))
    print("KERNEL_OK")
</pallas_src>

<mosaic_0001>
module attributes {stable_mosaic.version = 11 : i64} {
  func.func @_copy_kernel(%arg0: i32, %arg1: memref<8x256xf32, #tpu.memory_space<vmem>>, %arg2: memref<8x256xf32, #tpu.memory_space<vmem>>) attributes {dimension_semantics = [#tpu.dimension_semantics<arbitrary>], iteration_bounds = array<i64: 1>, scalar_prefetch = 0 : i64, scratch_operands = 0 : i64, tpu.core_type = #tpu.core_type<tc>, window_params = [{transform_indices = @transform_0, window_bounds = array<i64: 8, 256>}, {transform_indices = @transform_1, window_bounds = array<i64: 8, 256>}]} {
    %c0 = arith.constant 0 : index
    %c0_0 = arith.constant 0 : index
    %0 = vector.load %arg1[%c0, %c0_0] : memref<8x256xf32, #tpu.memory_space<vmem>>, vector<8x256xf32>
    %c0_1 = arith.constant 0 : index
    %c0_2 = arith.constant 0 : index
    %1 = vector.load %arg2[%c0_1, %c0_2] : memref<8x256xf32, #tpu.memory_space<vmem>>, vector<8x256xf32>
    tpu.vector_store %arg2[%c0_1, %c0_2], %0 {strides = array<i32>} : memref<8x256xf32, #tpu.memory_space<vmem>>, vector<8x256xf32>,
    return
  }
  func.func @transform_0(%arg0: i32) -> (i32, i32) {
    %c0_i32 = arith.constant 0 : i32
    %c0_i32_0 = arith.constant 0 : i32
    return %arg0, %c0_i32 : i32, i32
  }
  func.func @transform_1(%arg0: i32) -> (i32, i32) {
    %c0_i32 = arith.constant 0 : i32
    %c0_i32_0 = arith.constant 0 : i32
    return %arg0, %c0_i32 : i32, i32
  }
}

</mosaic_0001>

<bundles_post_ra>
// kernel: tpu_custom_call.1
= control target key start
LH: loop header
LB: loop body
LE: loop exit
PB: predicated region body
PF: predicated region fallthrough
CT: control target
= control target key end

     0   :  { %6 = vsyncpa [#allocation3], 0  ;;  %s126_s0 = inlined_call_operand.hbm [shape: f32[8,256], index: 0, kind: input, shape index: {}]   ;;  %s127_s1 = inlined_call_operand.hbm [shape: f32[8,256], index: 1, kind: output, shape index: {}]  }
   0x1   :  { %7 = vsyncpa [#allocation4], 0  ;;  %s90_s6 = smov [#allocation2]   ;;  %s42_s10 = scalar_lea.hbm %s126_s0, 256 }
   0x2   :  { %s14_s7 = sshll.u32 %s90_s6, 4  ;;  %p43_p0 = scmp.ne.s32.totalorder %s126_s0, %s42_s10  ;;  %s15_s7 = int_to_ptr.vmem [resolvable:$true] %s14_s7 }
   0x3   :  { %p46_p1 = scmp.lt.u32.totalorder %s42_s10, %s126_s0 }
   0x5   :  { %p48_p2 = pnand %p46_p1, %p43_p0 }
   0x7   :  { %51 = shalt.err (!%p48_p2)
}
   0x8   :  { %s52_s15 = scalar_lea.vmem %s15_s7, 256  ;;  %p57_p4 = scmp.lt.s32.totalorder %s15_s7, %s15_s7 }
   0x9   :  { %p53_p3 = scmp.ne.s32.totalorder %s15_s7, %s52_s15  ;;  %p58_p5 = scmp.lt.s32.totalorder %s52_s15, %s52_s15 }
   0xb   :  { %p59_p6 = por %p58_p5, %p57_p4 }
   0xd   :  { %p60_p7 = pnand %p59_p6, %p53_p3 }
   0xf   :  { %63 = shalt.err (!%p60_p7)
}
  0x10   :  { %17 = dma.hbm_to_vmem [thread:$0]  %s126_s0, 256, %s15_s7, [#allocation3]  }
  0x11   :  { %86 = dma.done.wait [#allocation3], 256  }
  0x12   :  { %87 = vsyncadd [#allocation3], 4294967040  ;;  %s91_s18 = smov [#allocation5]   ;;  %v21_v0 = vld [vmem:[#allocation2] sm:$0xff]  ;;  %v22_v1 = vld [vmem:[#allocation2 + $0x8] sm:$0xff] }
  0x13   :  { %s31_s19 = sshll.u32 %s91_s18, 4  ;;  %23 = vst [vmem:[#allocation5] sm:$0xff] %v21_v0  ;;  %24 = vst [vmem:[#allocation5 + $0x8] sm:$0xff] %v22_v1  ;;  %s32_s19 = int_to_ptr.vmem [resolvable:$true] %s31_s19 }
  0x14   :  { %s64_s20 = scalar_lea.vmem %s32_s19, 256  ;;  %p69_p9 = scmp.lt.s32.totalorder %s32_s19, %s32_s19 }
  0x15   :  { %p65_p8 = scmp.ne.s32.totalorder %s32_s19, %s64_s20  ;;  %p70_p10 = scmp.lt.s32.totalorder %s64_s20, %s64_s20 }
  0x17   :  { %p71_p11 = por %p70_p10, %p69_p9 }
  0x19   :  { %p72_p12 = pnand %p71_p11, %p65_p8 }
  0x1b   :  { %75 = shalt.err (!%p72_p12)
}
  0x1c   :  { %s76_s0 = scalar_lea.hbm %s127_s1, 256 }
  0x1d   :  { %p77_p13 = scmp.ne.s32.totalorder %s127_s1, %s76_s0  ;;  %p80_p0 = scmp.lt.u32.totalorder %s76_s0, %s127_s1 }
  0x1f   :  { %p82_p1 = pnand %p80_p0, %p77_p13 }
  0x21   :  { %85 = shalt.err (!%p82_p1)
}
  0x22   :  { %34 = dma.vmem_to_hbm [thread:$0]  %s32_s19, 256, %s127_s1, [#allocation4]  }
  0x23   :  { %88 = dma.done.wait [#allocation4], 256  }
  0x24   :  { %89 = vsyncadd [#allocation4], 4294967040 }
  0x25   :  { %38 = vsyncpa [#allocation3], 1 }
  0x26   :  { %39 = vsyncpa [#allocation4], 1 }

</bundles_post_ra>
